<compile_context>
chip_gen: v7x
topology: tpu7x:2x2x1
jax: 0.10.0
libtpu: 0.0.40
codegen_flags: <defaults>
</compile_context>

<pallas_src>
import jax
import jax.numpy as jnp
from jax.experimental import pallas as pl
from jax.experimental.pallas import tpu as pltpu


def _lama_kernel(w_ref, b_ref, img_ref, mask_ref, out_ref):
    # w_ref   : (12,) f32 SMEM   1x1-conv weight W[in_ch, out_ch], row-major flat
    # b_ref   : (3,)  f32 SMEM   bias per output channel
    # img_ref : (1, 3, T) f32    RGB planes, pixels on the lane axis
    # mask_ref: (1, 1, T) f32    inpainting mask (1 = hole)
    # out_ref : (1, 3, T) uint8
    img = img_ref[0]                 # (3, T)
    mask = mask_ref[0]               # (1, T)
    keep = 1.0 - mask
    masked = img * keep              # (3, T) -- zero out the hole (sublane broadcast)

    r = masked[0:1, :]
    g = masked[1:2, :]
    bl = masked[2:3, :]

    # "generator": 1x1 conv over [masked_img(3) | mask(1)] -> 3, as scalar FMAs.
    preds = []
    for c in range(3):               # static python loop, fully unrolled
        lin = (r * w_ref[0 * 3 + c]
               + g * w_ref[1 * 3 + c]
               + bl * w_ref[2 * 3 + c]
               + mask * w_ref[3 * 3 + c]
               + b_ref[c])
        preds.append(jax.nn.sigmoid(lin))
    pred = jnp.concatenate(preds, axis=0)        # (3, T)

    # LaMa-style composition: keep known pixels, fill the hole with prediction.
    inpainted = mask * pred + keep * img

    # Wrapper semantics: inpainted * 255.0 -> clamp(0, 255) -> uint8 (truncating cast).
    scaled = jnp.clip(inpainted * 255.0, 0.0, 255.0)
    out_ref[0] = scaled.astype(jnp.uint8)


def _pick_pixel_tile(num_pixels, target_block_bytes):
    """Largest lane-dense pixel tile (multiple of 128 dividing P) near the target."""
    target_pix = max(128, target_block_bytes // 12)   # 3 channels * 4 B per pixel
    if num_pixels <= target_pix:
        return num_pixels                             # single block per image
    if num_pixels % 128 != 0:
        return num_pixels                             # fall back to full-extent block
    t = min((target_pix // 128) * 128, num_pixels)
    while t >= 128:
        if num_pixels % t == 0:
            return t
        t -= 128
    return num_pixels


def lama_forward(image_nchw, mask_nchw, w, b, *, target_block_bytes=2 << 20):
    """image_nchw: (N,3,H,W) f32, mask_nchw: (N,1,H,W) f32 -> (N,3,H,W) uint8."""
    N, C, H, W = image_nchw.shape
    assert C == 3 and mask_nchw.shape == (N, 1, H, W)
    P = H * W

    # Free reshapes (no data movement): planar NCHW with pixels flattened last.
    img = image_nchw.reshape(N, 3, P)
    msk = mask_nchw.reshape(N, 1, P)
    w_flat = w.reshape(12).astype(jnp.float32)   # W[in_ch, out_ch] row-major
    b_flat = b.reshape(3).astype(jnp.float32)

    T = _pick_pixel_tile(P, target_block_bytes)
    assert P % T == 0

    out = pl.pallas_call(
        _lama_kernel,
        out_shape=jax.ShapeDtypeStruct((N, 3, P), jnp.uint8),
        grid_spec=pltpu.PrefetchScalarGridSpec(
            num_scalar_prefetch=2,                    # w_flat, b_flat -> SMEM
            grid=(N, P // T),
            in_specs=[
                pl.BlockSpec((1, 3, T), lambda n, p, w_s, b_s: (n, 0, p)),  # image
                pl.BlockSpec((1, 1, T), lambda n, p, w_s, b_s: (n, 0, p)),  # mask
            ],
            out_specs=pl.BlockSpec((1, 3, T), lambda n, p, w_s, b_s: (n, 0, p)),
        ),
        compiler_params=pltpu.CompilerParams(
            dimension_semantics=("parallel", "parallel"),
            vmem_limit_bytes=32 * 1024 * 1024,        # headroom on v5e's 16 MiB default
        ),
    )(w_flat, b_flat, img, msk)

    return out.reshape(N, 3, H, W)


def _reference(image_nchw, mask_nchw, w, b):
    """Pure-JAX reference of the same forward, for a correctness check."""
    img = image_nchw                                   # (N,3,H,W)
    msk = mask_nchw                                    # (N,1,H,W)
    masked = img * (1.0 - msk)
    pred = (jnp.einsum("nihw,ic->nchw", masked, w[0:3])
            + msk * w[3].reshape(1, 3, 1, 1)
            + b[0].reshape(1, 3, 1, 1))
    pred = jax.nn.sigmoid(pred)
    inpainted = msk * pred + (1.0 - msk) * img
    return jnp.clip(inpainted * 255.0, 0.0, 255.0).astype(jnp.uint8)


if __name__ == "__main__":
    key = jax.random.PRNGKey(0)
    k_img, k_msk, k_w, k_b = jax.random.split(key, 4)

    N, H, W = 2, 16, 16
    image = jax.random.uniform(k_img, (N, 3, H, W), dtype=jnp.float32)        # values in [0,1]
    mask = (jax.random.uniform(k_msk, (N, 1, H, W)) > 0.5).astype(jnp.float32)

    # Deterministic stand-in generator parameters (1x1 conv: 4 in-ch -> 3 out-ch).
    w = jax.random.normal(k_w, (4, 3), dtype=jnp.float32) * 0.5
    b = jax.random.normal(k_b, (1, 3), dtype=jnp.float32) * 0.1

    ref = jax.block_until_ready(_reference(image, mask, w, b))

    # Single-block-per-image path.
    out = jax.block_until_ready(lama_forward(image, mask, w, b))
    assert out.shape == (N, 3, H, W) and out.dtype == jnp.uint8
    # uint8 truncation at the 255-scale boundary: allow off-by-one from FMA ordering.
    assert int(jnp.max(jnp.abs(out.astype(jnp.int32) - ref.astype(jnp.int32)))) <= 1

    # Multi-block tiling path (forces T=128 -> grid=(2,2)).
    out_tiled = jax.block_until_ready(
        lama_forward(image, mask, w, b, target_block_bytes=1536))
    assert int(jnp.max(jnp.abs(out_tiled.astype(jnp.int32) - ref.astype(jnp.int32)))) <= 1

    print("KERNEL_OK")
</pallas_src>

<mosaic_0001>
module attributes {stable_mosaic.version = 11 : i64} {
  func.func @_lama_kernel(%arg0: i32, %arg1: i32, %arg2: memref<12xf32, #tpu.memory_space<smem>>, %arg3: memref<3xf32, #tpu.memory_space<smem>>, %arg4: memref<1x3x256xf32, #tpu.memory_space<vmem>>, %arg5: memref<1x1x256xf32, #tpu.memory_space<vmem>>, %arg6: memref<1x3x256xi8, #tpu.memory_space<vmem>>) attributes {dimension_semantics = [#tpu.dimension_semantics<parallel>, #tpu.dimension_semantics<parallel>], iteration_bounds = array<i64: 2, 1>, scalar_prefetch = 2 : i64, scratch_operands = 0 : i64, tpu.core_type = #tpu.core_type<tc>, window_params = [{transform_indices = @transform_0, window_bounds = array<i64: 1, 3, 256>}, {transform_indices = @transform_1, window_bounds = array<i64: 1, 1, 256>}, {transform_indices = @transform_2, window_bounds = array<i64: 1, 3, 256>}]} {
    %c0 = arith.constant 0 : index
    %c0_0 = arith.constant 0 : index
    %c0_1 = arith.constant 0 : index
    %0 = vector.load %arg4[%c0, %c0_0, %c0_1] : memref<1x3x256xf32, #tpu.memory_space<vmem>>, vector<1x3x256xf32>
    %1 = vector.shape_cast %0 : vector<1x3x256xf32> to vector<3x256xf32>
    %c0_2 = arith.constant 0 : index
    %c0_3 = arith.constant 0 : index
    %c0_4 = arith.constant 0 : index
    %2 = vector.load %arg5[%c0_2, %c0_3, %c0_4] : memref<1x1x256xf32, #tpu.memory_space<vmem>>, vector<1x1x256xf32>
    %3 = vector.shape_cast %2 : vector<1x1x256xf32> to vector<1x256xf32>
    %cst = arith.constant 1.000000e+00 : f32
    %4 = vector.broadcast %cst : f32 to vector<1x256xf32>
    %5 = arith.subf %4, %3 : vector<1x256xf32>
    %6 = vector.broadcast %5 : vector<1x256xf32> to vector<3x256xf32>
    %7 = arith.mulf %1, %6 : vector<3x256xf32>
    %8 = vector.extract_strided_slice %7 {offsets = [0, 0], sizes = [1, 256], strides = [1, 1]} : vector<3x256xf32> to vector<1x256xf32>
    %9 = vector.extract_strided_slice %7 {offsets = [1, 0], sizes = [1, 256], strides = [1, 1]} : vector<3x256xf32> to vector<1x256xf32>
    %10 = vector.extract_strided_slice %7 {offsets = [2, 0], sizes = [1, 256], strides = [1, 1]} : vector<3x256xf32> to vector<1x256xf32>
    %c0_5 = arith.constant 0 : index
    %11 = memref.load %arg2[%c0_5] : memref<12xf32, #tpu.memory_space<smem>>
    %12 = vector.broadcast %11 : f32 to vector<1x256xf32>
    %13 = arith.mulf %8, %12 : vector<1x256xf32>
    %c3 = arith.constant 3 : index
    %14 = memref.load %arg2[%c3] : memref<12xf32, #tpu.memory_space<smem>>
    %15 = vector.broadcast %14 : f32 to vector<1x256xf32>
    %16 = arith.mulf %9, %15 : vector<1x256xf32>
    %17 = arith.addf %13, %16 : vector<1x256xf32>
    %c6 = arith.constant 6 : index
    %18 = memref.load %arg2[%c6] : memref<12xf32, #tpu.memory_space<smem>>
    %19 = vector.broadcast %18 : f32 to vector<1x256xf32>
    %20 = arith.mulf %10, %19 : vector<1x256xf32>
    %21 = arith.addf %17, %20 : vector<1x256xf32>
    %c9 = arith.constant 9 : index
    %22 = memref.load %arg2[%c9] : memref<12xf32, #tpu.memory_space<smem>>
    %23 = vector.broadcast %22 : f32 to vector<1x256xf32>
    %24 = arith.mulf %3, %23 : vector<1x256xf32>
    %25 = arith.addf %21, %24 : vector<1x256xf32>
    %c0_6 = arith.constant 0 : index
    %26 = memref.load %arg3[%c0_6] : memref<3xf32, #tpu.memory_space<smem>>
    %27 = vector.broadcast %26 : f32 to vector<1x256xf32>
    %28 = arith.addf %25, %27 : vector<1x256xf32>
    %29 = arith.negf %28 : vector<1x256xf32>
    %30 = math.exp %29 : vector<1x256xf32>
    %cst_7 = arith.constant 1.000000e+00 : f32
    %31 = vector.broadcast %cst_7 : f32 to vector<1x256xf32>
    %32 = arith.addf %31, %30 : vector<1x256xf32>
    %33 = arith.divf %31, %32 : vector<1x256xf32>
    %c1 = arith.constant 1 : index
    %34 = memref.load %arg2[%c1] : memref<12xf32, #tpu.memory_space<smem>>
    %35 = vector.broadcast %34 : f32 to vector<1x256xf32>
    %36 = arith.mulf %8, %35 : vector<1x256xf32>
    %c4 = arith.constant 4 : index
    %37 = memref.load %arg2[%c4] : memref<12xf32, #tpu.memory_space<smem>>
    %38 = vector.broadcast %37 : f32 to vector<1x256xf32>
    %39 = arith.mulf %9, %38 : vector<1x256xf32>
    %40 = arith.addf %36, %39 : vector<1x256xf32>
    %c7 = arith.constant 7 : index
    %41 = memref.load %arg2[%c7] : memref<12xf32, #tpu.memory_space<smem>>
    %42 = vector.broadcast %41 : f32 to vector<1x256xf32>
    %43 = arith.mulf %10, %42 : vector<1x256xf32>
    %44 = arith.addf %40, %43 : vector<1x256xf32>
    %c10 = arith.constant 10 : index
    %45 = memref.load %arg2[%c10] : memref<12xf32, #tpu.memory_space<smem>>
    %46 = vector.broadcast %45 : f32 to vector<1x256xf32>
    %47 = arith.mulf %3, %46 : vector<1x256xf32>
    %48 = arith.addf %44, %47 : vector<1x256xf32>
    %c1_8 = arith.constant 1 : index
    %49 = memref.load %arg3[%c1_8] : memref<3xf32, #tpu.memory_space<smem>>
    %50 = vector.broadcast %49 : f32 to vector<1x256xf32>
    %51 = arith.addf %48, %50 : vector<1x256xf32>
    %52 = arith.negf %51 : vector<1x256xf32>
    %53 = math.exp %52 : vector<1x256xf32>
    %cst_9 = arith.constant 1.000000e+00 : f32
    %54 = vector.broadcast %cst_9 : f32 to vector<1x256xf32>
    %55 = arith.addf %54, %53 : vector<1x256xf32>
    %56 = arith.divf %54, %55 : vector<1x256xf32>
    %c2 = arith.constant 2 : index
    %57 = memref.load %arg2[%c2] : memref<12xf32, #tpu.memory_space<smem>>
    %58 = vector.broadcast %57 : f32 to vector<1x256xf32>
    %59 = arith.mulf %8, %58 : vector<1x256xf32>
    %c5 = arith.constant 5 : index
    %60 = memref.load %arg2[%c5] : memref<12xf32, #tpu.memory_space<smem>>
    %61 = vector.broadcast %60 : f32 to vector<1x256xf32>
    %62 = arith.mulf %9, %61 : vector<1x256xf32>
    %63 = arith.addf %59, %62 : vector<1x256xf32>
    %c8 = arith.constant 8 : index
    %64 = memref.load %arg2[%c8] : memref<12xf32, #tpu.memory_space<smem>>
    %65 = vector.broadcast %64 : f32 to vector<1x256xf32>
    %66 = arith.mulf %10, %65 : vector<1x256xf32>
    %67 = arith.addf %63, %66 : vector<1x256xf32>
    %c11 = arith.constant 11 : index
    %68 = memref.load %arg2[%c11] : memref<12xf32, #tpu.memory_space<smem>>
    %69 = vector.broadcast %68 : f32 to vector<1x256xf32>
    %70 = arith.mulf %3, %69 : vector<1x256xf32>
    %71 = arith.addf %67, %70 : vector<1x256xf32>
    %c2_10 = arith.constant 2 : index
    %72 = memref.load %arg3[%c2_10] : memref<3xf32, #tpu.memory_space<smem>>
    %73 = vector.broadcast %72 : f32 to vector<1x256xf32>
    %74 = arith.addf %71, %73 : vector<1x256xf32>
    %75 = arith.negf %74 : vector<1x256xf32>
    %76 = math.exp %75 : vector<1x256xf32>
    %cst_11 = arith.constant 1.000000e+00 : f32
    %77 = vector.broadcast %cst_11 : f32 to vector<1x256xf32>
    %78 = arith.addf %77, %76 : vector<1x256xf32>
    %79 = arith.divf %77, %78 : vector<1x256xf32>
    %80 = tpu.concatenate %33, %56, %79 in 0 : vector<1x256xf32>, vector<1x256xf32>, vector<1x256xf32> -> vector<3x256xf32>
    %81 = vector.broadcast %3 : vector<1x256xf32> to vector<3x256xf32>
    %82 = arith.mulf %81, %80 : vector<3x256xf32>
    %83 = vector.broadcast %5 : vector<1x256xf32> to vector<3x256xf32>
    %84 = arith.mulf %83, %1 : vector<3x256xf32>
    %85 = arith.addf %82, %84 : vector<3x256xf32>
    %cst_12 = arith.constant 2.550000e+02 : f32
    %86 = vector.broadcast %cst_12 : f32 to vector<3x256xf32>
    %87 = arith.mulf %85, %86 : vector<3x256xf32>
    %cst_13 = arith.constant 0.000000e+00 : f32
    %cst_14 = arith.constant 2.550000e+02 : f32
    %88 = vector.broadcast %cst_13 : f32 to vector<3x256xf32>
    %89 = arith.maximumf %88, %87 : vector<3x256xf32>
    %90 = vector.broadcast %cst_14 : f32 to vector<3x256xf32>
    %91 = arith.minimumf %90, %89 : vector<3x256xf32>
    %92 = arith.fptoui %91 : vector<3x256xf32> to vector<3x256xi8>
    %c0_15 = arith.constant 0 : index
    %c0_16 = arith.constant 0 : index
    %c0_17 = arith.constant 0 : index
    %93 = vector.load %arg6[%c0_15, %c0_16, %c0_17] : memref<1x3x256xi8, #tpu.memory_space<vmem>>, vector<1x3x256xi8>
    %94 = vector.shape_cast %93 : vector<1x3x256xi8> to vector<3x256xi8>
    %95 = vector.shape_cast %92 : vector<3x256xi8> to vector<1x3x256xi8>
    tpu.vector_store %arg6[%c0_15, %c0_16, %c0_17], %95 {strides = array<i32>} : memref<1x3x256xi8, #tpu.memory_space<vmem>>, vector<1x3x256xi8>,
    return
  }
  func.func @transform_0(%arg0: i32, %arg1: i32, %arg2: memref<12xf32, #tpu.memory_space<smem>>, %arg3: memref<3xf32, #tpu.memory_space<smem>>) -> (i32, i32, i32) {
    %c0_i32 = arith.constant 0 : i32
    %c0_i32_0 = arith.constant 0 : i32
    return %arg0, %c0_i32, %arg1 : i32, i32, i32
  }
  func.func @transform_1(%arg0: i32, %arg1: i32, %arg2: memref<12xf32, #tpu.memory_space<smem>>, %arg3: memref<3xf32, #tpu.memory_space<smem>>) -> (i32, i32, i32) {
    %c0_i32 = arith.constant 0 : i32
    %c0_i32_0 = arith.constant 0 : i32
    return %arg0, %c0_i32, %arg1 : i32, i32, i32
  }
  func.func @transform_2(%arg0: i32, %arg1: i32, %arg2: memref<12xf32, #tpu.memory_space<smem>>, %arg3: memref<3xf32, #tpu.memory_space<smem>>) -> (i32, i32, i32) {
    %c0_i32 = arith.constant 0 : i32
    %c0_i32_0 = arith.constant 0 : i32
    return %arg0, %c0_i32, %arg1 : i32, i32, i32
  }
}

</mosaic_0001>

<bundles_post_ra>
// kernel: tpu_custom_call.1
= control target key start
LH: loop header
LB: loop body
LE: loop exit
PB: predicated region body
PF: predicated region fallthrough
CT: control target
= control target key end

     0   :  { %s1006_s0 = inlined_call_operand.vmem [shape: f32[12], index: 0, kind: input, shape index: {}]   ;;  %s1007_s2 = inlined_call_operand.vmem [shape: f32[2,3,256], index: 2, kind: input, shape index: {}]   ;;  %s1008_s3 = inlined_call_operand.vmem [shape: f32[2,1,256], index: 3, kind: input, shape index: {}]   ;;  %s1009_s4 = inlined_call_operand.hbm [shape: u8[2,3,256], index: 4, kind: output, shape index: {}]   ;;  %s1010_s1 = inlined_call_operand.vmem [shape: f32[3], index: 1, kind: input, shape index: {}]  }
   0x1   :  { %s9_s17 = sshll.u32 %s1006_s0, 4  ;;  %s13_s20 = sshll.u32 %s1010_s1, 4  ;;  %s10_s17 = int_to_ptr.vmem [resolvable:$true] %s9_s17  ;;  %s14_s20 = int_to_ptr.vmem [resolvable:$true] %s13_s20 }
   0x2   :  { %s676_s21 = scalar_lea.vmem %s10_s17, 16  ;;  %p681_p1 = scmp.lt.s32.totalorder %s10_s17, %s10_s17 }
   0x3   :  { %p677_p0 = scmp.ne.s32.totalorder %s10_s17, %s676_s21  ;;  %p682_p2 = scmp.lt.s32.totalorder %s676_s21, %s676_s21 }
   0x5   :  { %p683_p3 = por %p682_p2, %p681_p1 }
   0x7   :  { %p684_p4 = pnand %p683_p3, %p677_p0 }
   0x9   :  { %687 = shalt.err (!%p684_p4)  }
   0xa   :  { %s782_s22 = smov [#allocation3]   ;;  %s688_s23 = scalar_lea.vmem %s14_s20, 16 }
   0xb   :  { %12 = dma.vmem_to_smem %s10_s17, 16, %s782_s22, [#allocation2] }
   0xc   :  { %p689_p5 = scmp.ne.s32.totalorder %s14_s20, %s688_s23  ;;  %p693_p6 = scmp.lt.s32.totalorder %s14_s20, %s14_s20 }
   0xd   :  { %p694_p7 = scmp.lt.s32.totalorder %s688_s23, %s688_s23 }
   0xf   :  { %p695_p8 = por %p694_p7, %p693_p6 }
  0x11   :  { %p696_p9 = pnand %p695_p8, %p689_p5 }
  0x13   :  { %699 = shalt.err (!%p696_p9)  }
  0x14   :  { %s783_s0 = smov [#allocation4]  }
  0x15   :  { %16 = dma.vmem_to_smem %s14_s20, 16, %s783_s0, [#allocation2] }
  0x16   :  { %752 = dma.done.wait [#allocation2], 32 }
  0x17   :  { %753 = vsyncadd [#allocation2], 4294967264 }
  0x18   :  { %18 = sfence }
  0x19   :  { %19 = vsyncpa [#allocation6], 0 }
  0x1a   :  { %21 = vsyncpa [#allocation6 + $0x1], 0  ;;  %s818_s1 = smov 0   ;;  %s820_s24 = smov 0  }
  0x1b   :  { %s822_s25 = smov 0   ;;  %s824_s26 = smov 0  }
  0x1c   :  { %s826_s27 = smov 0   ;;  %s828_s28 = smov 0  }
  0x1d LB: > { %s566_s29 = sadd.s32 4294967295, %s780_s28   ;;  %s567_s30 = sadd.s32 4294967294, %s780_s28   ;;  %s780_s28 = sphi %s828_s28, %s27_s28   ;;  %s776_s27 = sphi %s826_s27, %s1017_s27   ;;  %s772_s26 = sphi %s824_s26, %s1016_s26   ;;  %s768_s25 = sphi %s822_s25, %s1015_s25   ;;  %s764_s24 = sphi %s820_s24, %s1014_s24   ;;  %s760_s1 = sphi %s818_s1, %s1013_s1  }
  0x1e   : > { %s39_s5 = sadd.s32 1, %s776_s27  ;;  %s104_s6 = sadd.s32 1, %s768_s25 }
  0x1f   : > { %p41_p10 = scmp.ge.s32.totalorder %s39_s5, 2  ;;  %p114_p11 = scmp.ne.s32.totalorder %s768_s25, %s764_s24 }
  0x20   : > { %p115_p12 = scmp.eq.s32.totalorder %s566_s29, 1  ;;  %p120_p13 = scmp.ne.s32.totalorder %s764_s24, %s760_s1 }
  0x21   : > { %s1019_s5 = smov (%p41_p10, %s39_s5), 0  ;;  %p121_p1 = scmp.eq.s32.totalorder %s567_s30, 1 }
  0x22   : > { %p858_p0 = por %p115_p12, %p114_p11  ;;  %s99_s8 = ssub.s32 %s776_s27, %s1019_s5 }
  0x23   : > { %p570_p2 = scmp.ge.s32.totalorder %s780_s28, 1  ;;  %p102_p3 = scmp.eq.s32.totalorder %s99_s8, 0 }
  0x24   : > { %p865_p4 = por %p121_p1, %p120_p13  ;;  %p164_p5 = scmp.lt.s32.totalorder %s780_s28, 3 }
  0x25   : > { %s871_s10 = scalar_select %p102_p3, %s768_s25, %s104_s6  }
  0x26   : > { %p165_p6 = pnand %p570_p2, %p164_p5 }
  0x27   : > { %p199_p7 = scmp.lt.s32.totalorder (!%p165_p6), %s772_s26, 1  ;;  %v222_v0 = vlaneseq (!%p165_p6)  ;;  %s876_s11 = sld [smem:[#allocation3]] (!%p165_p6)  ;;  %v784_v5 = vmov (!%p165_p6), 286326784   ;;  %vm389_vm0 = vcmask (!%p165_p6), 1040384   ;;  %vm392_vm1 = vcmask (!%p165_p6), 1041408  }
  0x28   : > { %168 = sbr.rel (%p165_p6) target bundleno = 138 (0x8a), region = 28  ;;  %s878_s12 = sld [smem:[#allocation3 + $0x3]] (!%p165_p6)  ;;  %v257_v6 = vunpack.c.l.s4 (!%p165_p6), %v784_v5  ;;  %vm449_vm2 = vsmask.f32 (!%p165_p6), 512  ;;  %vm451_vm3 = vcmask (!%p165_p6), 1041409  }
  0x29   : > { %v874_v1 = vshrl.u32 (!%p165_p6), %v222_v0, 7  ;;  %s881_s14 = sld [smem:[#allocation3 + $0x6]] (!%p165_p6)  ;;  %s883_s15 = sld [smem:[#allocation3 + $0x9]] (!%p165_p6)  ;;  %vm452_vm4 = vsmask.f32 (!%p165_p6), 1536  ;;  %vm450_vm5 = vmand (!%p165_p6), %vm389_vm0, %vm449_vm2 }
  0x2a   : > { %s581_s0 = sld [smem:[#allocation3 + $0x1]] (!%p165_p6)  ;;  %s582_s29 = sld [smem:[#allocation3 + $0x4]] (!%p165_p6)  ;;  %v258_v11 = vunpack.c.0.s8 (!%p165_p6), %v257_v6  ;;  %vm453_vm6 = vmand (!%p165_p6), %vm451_vm3, %vm452_vm4 }
  0x2b   : > { %v889_v2 = vsub.s32 (!%p165_p6), 0, %v874_v1  ;;  %v228_v3 = vsub.s32 (!%p165_p6), 1, %v874_v1  ;;  %s584_s30 = sld [smem:[#allocation3 + $0x7]] (!%p165_p6)  ;;  %s586_s6 = sld [smem:[#allocation3 + $0xa]] (!%p165_p6)  ;;  %vm454_vm7 = vmor (!%p165_p6), %vm453_vm6, %vm450_vm5 }
  0x2c   : > { %s901_s8 = sld [smem:[#allocation3 + $0x2]] (!%p165_p6)  ;;  %v261_v21 = vsub.s32 (!%p165_p6), %v258_v11, %v874_v1  ;;  %s917_s18 = sld [smem:[#allocation4]] (!%p165_p6) }
  0x2d   : > { %v234_v14 = vstv (!%p165_p6), %s876_s11  ;;  %s922_s11 = sld [smem:[#allocation4 + $0x1]] (!%p165_p6)  ;;  %s604_s19 = sshll.u32 (!%p165_p6), %s772_s26, 5 }
  0x2e   : > { %v237_v15 = vstv (!%p165_p6), %s878_s12  ;;  %s595_s12 = sld [smem:[#allocation4 + $0x2]] (!%p165_p6) }
  0x2f   : > { %s200_s13 = scalar_select %p199_p7, %s772_s26, 1  ;;  %v253_v13 = vstv %s883_s15  ;;  %v245_v16 = vstv %s881_s14 }
  0x30   : > { %v275_v18 = vstv %s581_s0  ;;  %v278_v19 = vstv %s582_s29  ;;  %s195_s14 = sand.u32 1, %s764_s24   ;;  %s959_s0 = scalar_lea.hbm %s1009_s4, %s604_s19 }
  0x31   : > { %s603_s16 = sshll.u32 %s200_s13, 3  ;;  %s574_s17 = sshll.u32 %s200_s13, 1  ;;  %v286_v22 = vstv %s584_s30  ;;  %v294_v23 = vstv %s586_s6 }
  0x32   : > { %s215_s20 = scalar_lea.vmem %s1008_s3, %s574_s17  ;;  %s206_s23 = scalar_lea.vmem %s1007_s2, %s603_s16  ;;  %v316_v33 = vstv %s901_s8  ;;  %v266_v49 = vstv %s917_s18 }
  0x33   : > { %v895_v4 = vld [vmem:[%s215_s20] sm:$0x3]  ;;  %s903_s13 = sld [smem:[#allocation3 + $0x5]]  ;;  %s906_s16 = sld [smem:[#allocation3 + $0x8]]  ;;  %v307_v53 = vstv %s922_s11 }
  0x34   : > { %v220_v7 = vsub.f32 1.0, %v895_v4  ;;  %v218_v10 = vld [vmem:[%s206_s23] sm:$0x77]  ;;  %s908_s17 = sld [smem:[#allocation3 + $0xb]]  ;;  %v254_v20 = vmul.f32 %v253_v13, %v895_v4  ;;  %v295_v30 = vmul.f32 %v294_v23, %v895_v4  ;;  %v348_v60 = vstv %s595_s12  ;;  %s571_s15 = sshll.u32 %s195_s14, 1 }
  0x35   : > { %v399_v23 = vrot.slane %v895_v4, %v889_v2  ;;  %s197_s20 = scalar_lea.vmem [#allocation5], %s571_s15  ;;  %s459_s29 = scalar_lea.sflag [#allocation6], %s195_s14 }
  0x36   : > { %v225_v8 = vrot.slane %v220_v7, %v889_v2  ;;  %v229_v9 = vrot.slane %v220_v7, %v228_v3  ;;  %v262_v35 = vrot.slane %v254_v20, %v261_v21  ;;  %v303_v44 = vrot.slane %v295_v30, %v261_v21  ;;  %s475_s21 = sshll.u32 %s197_s20, 4  ;;  %s786_s26 = smov [#allocation5]   ;;  %s961_s21 = int_to_ptr.vmem [resolvable:$true] %s475_s21 }
  0x37   : > { %s700_s30 = scalar_lea.vmem %s961_s21, 32  ;;  %s704_s6 = sshll.u32 %s786_s26, 4  ;;  %s705_s6 = int_to_ptr.vmem [resolvable:$false] %s704_s6 }
  0x38   : > { %v230_v12 = vcombine.low %v225_v8, %v229_v9  ;;  %p701_p8 = scmp.ne.s32.totalorder %s961_s21, %s700_s30  ;;  %s706_s8 = scalar_lea.vmem %s705_s6, 64 }
  0x39   : > { %v319_v34 = vstv %s903_s13  ;;  %v327_v41 = vstv %s906_s16  ;;  %p707_p11 = scmp.lt.s32.totalorder %s961_s21, %s705_s6  ;;  %p708_p12 = scmp.lt.s32.totalorder %s706_s8, %s700_s30 }
  0x3a   : > { %v913_v17 = vmul.f32 %v230_v12, %v218_v10  ;;  %v335_v42 = vstv %s908_s17  ;;  %v363_v12 = vsub.s32 4, %v874_v1  ;;  %p702_p9 = pnand %p701_p8, %p858_p0 }
  0x3b   : > { %v336_v46 = vmul.f32 %v335_v42, %v895_v4  ;;  %p709_p13 = por %p708_p12, %p707_p11 }
  0x3c   : > { %v235_v24 = vmul.f32 %v234_v14, %v913_v17  ;;  %v238_v25 = vmul.f32 %v237_v15, %v913_v17  ;;  %v246_v26 = vmul.f32 %v245_v16, %v913_v17  ;;  %v276_v27 = vmul.f32 %v275_v18, %v913_v17  ;;  %p703_p10 = pneg %p702_p9 }
  0x3d   : > { %v279_v28 = vmul.f32 %v278_v19, %v913_v17  ;;  %v287_v29 = vmul.f32 %v286_v22, %v913_v17  ;;  %v317_v38 = vmul.f32 %v316_v33, %v913_v17  ;;  %v320_v40 = vmul.f32 %v319_v34, %v913_v17 }
  0x3e   : > { %v576_v31 = vrot.slane %v238_v25, 9  ;;  %v578_v32 = vrot.slane %v246_v26, 10  ;;  %v328_v45 = vmul.f32 %v327_v41, %v913_v17  ;;  %v344_v55 = vrot.slane %v336_v46, %v261_v21  ;;  %v455_v46 = vld [vmem:[%s197_s20] sm:$0x3]  ;;  %p710_p1 = pnand %p709_p13, %p703_p10 }
  0x3f   : > { %v583_v36 = vrot.slane %v279_v28, 9  ;;  %v585_v37 = vrot.slane %v287_v29, 10  ;;  %v591_v48 = vrot.slane %v320_v40, 9 }
  0x40   : > { %v243_v39 = vadd.f32 %v576_v31, %v235_v24  ;;  %v593_v51 = vrot.slane %v328_v45, 10  ;;  %v403_v24 = vrot.slane %v895_v4, %v228_v3 }
  0x41   : > { %v284_v43 = vadd.f32 %v583_v36, %v276_v27  ;;  %v325_v54 = vadd.f32 %v591_v48, %v317_v38  ;;  %v409_v27 = vcombine.high %v913_v17, %v913_v17  ;;  %v785_v36 = vmov 1966171168  }
  0x42   : > { %v251_v47 = vadd.f32 %v578_v32, %v243_v39 }
  0x43   : > { %v292_v50 = vadd.f32 %v585_v37, %v284_v43  ;;  %v333_v58 = vadd.f32 %v593_v51, %v325_v54  ;;  %v435_v37 = vunpack.c.l.s4 %v785_v36 }
  0x44   : > { %v264_v52 = vadd.f32 %v262_v35, %v251_v47 }
  0x45   : > { %v305_v56 = vadd.f32 %v303_v44, %v292_v50  ;;  %v346_v62 = vadd.f32 %v344_v55, %v333_v58  ;;  %v436_v39 = vunpack.c.0.s8 %v435_v37 }
  0x46   : > { %v267_v57 = vadd.f32 %v266_v49, %v264_v52 }
  0x47   : > { %v308_v59 = vadd.f32 %v307_v53, %v305_v56  ;;  %v349_v0 = vadd.f32 %v348_v60, %v346_v62  ;;  %v439_v43 = vsub.s32 %v436_v39, %v874_v1 }
  0x48   : > { %v580_v61 = vmul.f32 -1.442695, %v267_v57 }
  0x49   : > { %v588_v63 = vmul.f32 -1.442695, %v308_v59  ;;  %v596_v5 = vmul.f32 -1.442695, %v349_v0 }
  0x4a   : > { %664 = vpow2.f32 %v580_v61 }
  0x4b   : > { %666 = vpow2.f32 %v588_v63 }
  0x4c   : > { %668 = vpow2.f32 %v596_v5 }
  0x54   : > { %v665_v6 = vpop.eup %664 }
  0x55   : > { %v667_v7 = vpop.eup %666  ;;  %v271_v8 = vadd.f32 1.0, %v665_v6 }
  0x56   : > { %v312_v9 = vadd.f32 1.0, %v667_v7  ;;  %v669_v10 = vpop.eup %668 }
  0x57   : > { %670 = vrcp.f32 %v271_v8  ;;  %v353_v11 = vadd.f32 1.0, %v669_v10 }
  0x58   : > { %672 = vrcp.f32 %v312_v9 }
  0x59   : > { %674 = vrcp.f32 %v353_v11 }
  0x61   : > { %v671_v13 = vpop.eup %670 }
  0x62   : > { %v673_v14 = vpop.eup %672  ;;  %v360_v15 = vrot.slane %v671_v13, %v889_v2  ;;  %v364_v16 = vrot.slane %v671_v13, %v363_v12 }
  0x63   : > { %v371_v18 = vrot.slane %v673_v14, %v889_v2  ;;  %v375_v19 = vrot.slane %v673_v14, %v363_v12  ;;  %v675_v20 = vpop.eup %674 }
  0x64   : > { %v382_v25 = vrot.slane %v675_v20, %v889_v2  ;;  %v386_v26 = vrot.slane %v675_v20, %v363_v12 }
  0x65   : > { %v390_v21 = vsel %vm389_vm0, %v360_v15, %v371_v18  ;;  %v391_v22 = vsel %vm389_vm0, %v364_v16, %v375_v19 }
  0x66   : > { %v393_v28 = vsel %vm392_vm1, %v390_v21, %v382_v25  ;;  %v394_v29 = vsel %vm392_vm1, %v391_v22, %v386_v26 }
  0x67   : > { %v406_v30 = vmul.f32 %v399_v23, %v393_v28  ;;  %v407_v31 = vmul.f32 %v403_v24, %v394_v29 }
  0x69   : > { %v411_v32 = vadd.f32 %v406_v30, %v913_v17  ;;  %v412_v33 = vadd.f32 %v409_v27, %v407_v31 }
  0x6b   : > { %v413_v34 = vmul.f32 255.0, %v411_v32  ;;  %v414_v35 = vmul.f32 255.0, %v412_v33 }
  0x6d   : > { %v415_v38 = vmax.f32 %v413_v34, 0.0  ;;  %v416_v3 = vmax.f32 %v414_v35, 0.0 }
  0x6f   : > { %v417_v4 = vmin.f32 %v415_v38, 255.0  ;;  %v418_v2 = vmin.f32 %v416_v3, 255.0 }
  0x71   : > { %v419_v40 = vtrunc.f32 %v417_v4  ;;  %v420_v41 = vtrunc.f32 %v418_v2 }
  0x73   : > { %v421_v42 = vpack.c.f32.eXmY %v419_v40, %v419_v40, 56  ;;  %v427_v17 = vpack.c.f32.eXmY %v420_v41, %v420_v41, 56 }
  0x75   : > { %v597_v44 = vpack.c.b8 %v427_v17, %v421_v42 }
  0x77   : > { %v440_v45 = vrot.slane %v597_v44, %v439_v43 }
  0x79   : > { %v447_v47 = vrot.slane %v440_v45, %v439_v43 }
  0x7b   : > { %v456_v1 = vsel %vm454_vm7, %v447_v47, %v455_v46 }
  0x7c   : > { %457 = vst [vmem:[%s197_s20] sm:$0x3] %v456_v1 }
  0x7d   : > { %713 = shalt.err (!%p710_p1)
}
  0x7e   : > { %s714_s13 = scalar_lea.hbm %s959_s0, 32  ;;  %s718_s18 = scalar_lea.hbm %s1009_s4, 64 }
  0x7f   : > { %p715_p2 = scmp.ne.s32.totalorder %s959_s0, %s714_s13  ;;  %p719_p6 = scmp.lt.u32.totalorder %s959_s0, %s1009_s4 }
  0x80   : > { %p720_p7 = scmp.lt.u32.totalorder %s718_s18, %s714_s13  ;;  %p722_p9 = scmp.lt.u32.totalorder %s714_s13, %s959_s0 }
  0x81   : > { %p716_p3 = pnand %p715_p2, %p858_p0 }
  0x82   : > { %p721_p8 = por %p720_p7, %p719_p6 }
  0x83   : > { %p717_p5 = pneg %p716_p3 }
  0x84   : > { %p723_p10 = por %p722_p9, %p721_p8 }
  0x86   : > { %p724_p11 = pnand %p723_p10, %p717_p5 }
  0x88   : > { %727 = shalt.err (!%p724_p11)
}
  0x89   : > { %605 = dma.vmem_to_hbm [thread:$0]  (%p858_p0), %s961_s21, 32, %s959_s0, %s459_s29  }
  0x8a PF: > { %p611_p12 = scmp.ge.s32.totalorder %s780_s28, 2  ;;  %s487_s14 = sand.u32 1, %s760_s1  }
  0x8b   : > { %s488_s15 = scalar_lea.sflag [#allocation6], %s487_s14 }
  0x8c   : > { %p608_p13 = pnand %p611_p12, %p865_p4 }
  0x8e   : > { %755 = dma.done.wait (!%p608_p13), %s488_s15, 32  }
  0x8f   : > { %757 = vsyncadd (!%p608_p13), %s488_s15, 4294967264  ;;  %s27_s28 = sadd.s32 1, %s780_s28   ;;  %s1013_s1 = smov %s764_s24 }
  0x90   : > { %p24_p1 = scmp.ge.s32.totalorder %s27_s28, 4   ;;  %s1014_s24 = smov %s768_s25 }
  0x91   : > { %s1015_s25 = smov %s871_s10  ;;  %s1016_s26 = smov %s776_s27 }
  0x92   : > { %s1017_s27 = smov %s1019_s5  ;;  %26 = sbr.rel (!%p24_p1) target bundleno = 29 (0x1d), region = 66 }
  0x99   :  { %493 = vsyncpa [#allocation6], 1 }
  0x9a   :  { %495 = vsyncpa [#allocation6 + $0x1], 1 }

</bundles_post_ra>
